<compile_context>
chip_gen: v5e
topology: v5e:2x2
jax: 0.10.0
libtpu: 0.0.40
codegen_flags: <defaults>
</compile_context>

<pallas_src>
import functools

import jax
import jax.numpy as jnp
from jax import lax
from jax.experimental import pallas as pl
from jax.experimental.pallas import tpu as pltpu

WEIGHT = 0.5            # NNLoss `weight` argument (deterministic, set in-script)
REDUCTION = "mean"      # NNLoss `reduction` argument

_LANES = 128
_NUM_PARTIALS = 2       # leading 'parallel' grid axis (both TCs on v7x; harmless on
                        # single-TC v5e/v6e).
                        # TODO(synk): verify via xprof that this shards across both
                        # v7x TensorCores; if not, switch to pltpu.CORE_PARALLEL.
_ACC_ROWS = 32          # wide accumulator: 4 independent (8,128)-vreg add chains.


# ----------------------------------------------------------------------------
# Single-block path: whole (rows, 128) slab resident in VMEM, one invocation.
# Emits the RAW sum of squared differences; scale is applied in the wrapper.
# ----------------------------------------------------------------------------
def _sumsq_block_kernel(x_ref, t_ref, out_ref):
    d = x_ref[...].astype(jnp.float32) - t_ref[...].astype(jnp.float32)
    sq = d * d
    rows, lanes = sq.shape
    if rows % 8 == 0 and rows > 8:
        # Bulk of the reduce as vreg-wise VALU adds; one small XLU reduce at end.
        partial = sq.reshape(rows // 8, 8, lanes).sum(axis=0)
        out_ref[...] = jnp.sum(partial, keepdims=True)
    else:
        out_ref[...] = jnp.sum(sq, keepdims=True)


# ----------------------------------------------------------------------------
# Tiled path: grid (partial, step).  The output block (1, _ACC_ROWS, 128) stays
# resident across the 'arbitrary' step axis and acts as the accumulator (pure
# VALU adds); the final cross-lane reduce happens in the JAX wrapper.
# ----------------------------------------------------------------------------
def _sumsq_tiled_kernel(x_ref, t_ref, acc_ref, *, tile_rows, m_rows, need_mask):
    j = pl.program_id(1)

    @pl.when(j == 0)
    def _():
        acc_ref[...] = jnp.zeros_like(acc_ref)

    d = x_ref[...].astype(jnp.float32) - t_ref[...].astype(jnp.float32)
    sq = d * d

    if need_mask:
        # Ragged row tail handled in-kernel: logical (unclamped) row id of this
        # tile vs. static valid-row count.  Fully out-of-range tiles (index_map
        # clamps their DMA to the last valid block) contribute exactly zero.
        start = (pl.program_id(0) * pl.num_programs(1) + j) * tile_rows
        row = lax.broadcasted_iota(jnp.int32, (tile_rows, 1), 0) + start
        sq = jnp.where(row < m_rows, sq, 0.0)

    acc_ref[...] += sq.reshape(tile_rows // _ACC_ROWS, _ACC_ROWS, _LANES).sum(axis=0)[None]


def nn_loss_mse(x, t, *, weight=WEIGHT, reduction=REDUCTION,
                tile_rows=2048, single_block_max_rows=8192):
    """Pallas implementation of NNLoss(nn.MSELoss, reduction=..., weight=...)."""
    assert x.shape == t.shape
    n = int(x.size)

    if reduction == "mean":
        scale = (weight if weight is not None else 1.0) / float(n)
    elif reduction == "sum":
        scale = float(weight) if weight is not None else 1.0
    else:
        # TODO(synk): 'none' reduction returns the full unreduced tensor, not a scalar.
        raise NotImplementedError(reduction)

    # Flatten row-major.  No jnp.pad anywhere.
    # TODO(synk): for very large inputs whose native layout is not lane-aligned this
    # reshape is still one relayout copy per operand; consuming the native NCHW
    # layout with a BlockSpec over collapsed leading dims would remove it.
    xf = x.reshape(-1)
    tf = t.reshape(-1)
    m = n // _LANES
    rem = n - m * _LANES

    tail_sum = 0.0
    if rem:
        # < 128 elements: one tiny XLA op, negligible vs. any padded-copy approach.
        dt = xf[m * _LANES:].astype(jnp.float32) - tf[m * _LANES:].astype(jnp.float32)
        tail_sum = jnp.sum(dt * dt)
        xf = xf[:m * _LANES]
        tf = tf[:m * _LANES]

    if m == 0:
        return scale * tail_sum

    x2 = xf.reshape(m, _LANES)
    t2 = tf.reshape(m, _LANES)

    if m <= single_block_max_rows:
        # --- single-block path: whole slab in VMEM, no grid, no scratch --------
        out = pl.pallas_call(
            _sumsq_block_kernel,
            out_shape=jax.ShapeDtypeStruct((1, 1), jnp.float32),
            in_specs=[
                pl.BlockSpec(memory_space=pltpu.MemorySpace.VMEM),
                pl.BlockSpec(memory_space=pltpu.MemorySpace.VMEM),
            ],
            out_specs=pl.BlockSpec(memory_space=pltpu.MemorySpace.VMEM),
        )(x2, t2)
        return scale * (out[0, 0] + tail_sum)

    # --- tiled path: big streaming tiles, 2 partial accumulators ---------------
    assert tile_rows % _ACC_ROWS == 0
    steps = int(pl.cdiv(m, _NUM_PARTIALS * tile_rows))      # steps per partial
    last_block = int(pl.cdiv(m, tile_rows)) - 1              # last in-bounds block
    need_mask = (_NUM_PARTIALS * steps * tile_rows) != m

    def in_index(c, j):
        # Clamp so fully-out-of-range step tiles re-read the last valid block;
        # their contribution is masked to zero inside the kernel.
        return (jnp.minimum(c * steps + j, last_block), 0)

    kernel = functools.partial(_sumsq_tiled_kernel, tile_rows=tile_rows,
                               m_rows=m, need_mask=need_mask)
    partials = pl.pallas_call(
        kernel,
        out_shape=jax.ShapeDtypeStruct((_NUM_PARTIALS, _ACC_ROWS, _LANES), jnp.float32),
        grid=(_NUM_PARTIALS, steps),
        in_specs=[
            pl.BlockSpec((tile_rows, _LANES), in_index, pipeline_mode=pl.Buffered(3)),
            pl.BlockSpec((tile_rows, _LANES), in_index, pipeline_mode=pl.Buffered(3)),
        ],
        out_specs=pl.BlockSpec((1, _ACC_ROWS, _LANES), lambda c, j: (c, 0, 0)),
        compiler_params=pltpu.CompilerParams(
            dimension_semantics=("parallel", "arbitrary"),
            vmem_limit_bytes=32 * 1024 * 1024,
        ),
    )(x2, t2)
    # Raw partial accumulators -> one tiny wrapper-side reduce, then scale.
    return scale * (jnp.sum(partials) + tail_sum)


if __name__ == "__main__":
    key = jax.random.PRNGKey(0)
    kx, kt = jax.random.split(key)
    # NCHW inputs, as the torch loss would receive
    x = jax.random.normal(kx, (2, 4, 16, 16), dtype=jnp.float32)
    t = jax.random.normal(kt, (2, 4, 16, 16), dtype=jnp.float32)

    loss = nn_loss_mse(x, t)
    jax.block_until_ready(loss)

    # reference check (plain JAX)
    ref = WEIGHT * jnp.mean((x - t) ** 2)
    assert jnp.allclose(loss, ref, rtol=1e-5, atol=1e-6), (loss, ref)

    print("KERNEL_OK")
</pallas_src>

<mosaic_0001>
module attributes {stable_mosaic.version = 11 : i64} {
  func.func @_sumsq_block_kernel(%arg0: memref<16x128xf32, #tpu.memory_space<vmem>>, %arg1: memref<16x128xf32, #tpu.memory_space<vmem>>, %arg2: memref<1x1xf32, #tpu.memory_space<vmem>>) attributes {dimension_semantics = [], scalar_prefetch = 0 : i64, scratch_operands = 0 : i64, tpu.core_type = #tpu.core_type<tc>} {
    %c0 = arith.constant 0 : index
    %c0_0 = arith.constant 0 : index
    %0 = vector.load %arg0[%c0, %c0_0] : memref<16x128xf32, #tpu.memory_space<vmem>>, vector<16x128xf32>
    %c0_1 = arith.constant 0 : index
    %c0_2 = arith.constant 0 : index
    %1 = vector.load %arg1[%c0_1, %c0_2] : memref<16x128xf32, #tpu.memory_space<vmem>>, vector<16x128xf32>
    %2 = arith.subf %0, %1 : vector<16x128xf32>
    %3 = arith.mulf %2, %2 : vector<16x128xf32>
    %4 = vector.shape_cast %3 : vector<16x128xf32> to vector<2x8x128xf32>
    %cst = arith.constant dense<0.000000e+00> : vector<8x128xf32>
    %5 = vector.multi_reduction <add>, %4, %cst [0] : vector<2x8x128xf32> to vector<8x128xf32>
    %6 = vector.shape_cast %5 : vector<8x128xf32> to vector<1x8x128xf32>
    %cst_3 = arith.constant dense<0.000000e+00> : vector<1xf32>
    %7 = vector.multi_reduction <add>, %6, %cst_3 [1, 2] : vector<1x8x128xf32> to vector<1xf32>
    %8 = vector.shape_cast %7 : vector<1xf32> to vector<1x1x1xf32>
    %9 = vector.extract %8[0, 0, 0] : f32 from vector<1x1x1xf32>
    %10 = vector.broadcast %9 : f32 to vector<1x1xf32>
    %c0_4 = arith.constant 0 : index
    %c0_5 = arith.constant 0 : index
    %11 = vector.load %arg2[%c0_4, %c0_5] : memref<1x1xf32, #tpu.memory_space<vmem>>, vector<1x1xf32>
    tpu.vector_store %arg2[%c0_4, %c0_5], %10 {strides = array<i32>} : memref<1x1xf32, #tpu.memory_space<vmem>>, vector<1x1xf32>,
    return
  }
}

</mosaic_0001>

<bundles_post_ra>
// kernel: tpu_custom_call.1
= control target key start
LH: loop header
LB: loop body
LE: loop exit
PB: predicated region body
PF: predicated region fallthrough
CT: control target
= control target key end

     0   :  { %7 = vsyncpa [#allocation3], 0  ;;  %s197_s0 = inlined_call_operand.hbm [shape: f32[16,128], index: 0, kind: input, shape index: {}]   ;;  %s198_s1 = inlined_call_operand.hbm [shape: f32[16,128], index: 1, kind: input, shape index: {}]   ;;  %s199_s2 = inlined_call_operand.hbm [shape: f32[1,1], index: 2, kind: output, shape index: {}]  }
   0x1   :  { %8 = vsyncpa [#allocation6], 0 }
   0x2   :  { %9 = vsyncpa [#allocation4], 0  ;;  %s14_s11 = sshll.u32 %s197_s0, 4  ;;  %s168_s12 = smov [#allocation2]   ;;  %s15_s11 = int_to_ptr.hbm [resolvable:$true] %s14_s11 }
   0x3   :  { %s16_s13 = sshll.u32 %s168_s12, 4  ;;  %s27_s16 = sshll.u32 %s198_s1, 4  ;;  %s17_s13 = int_to_ptr.vmem [resolvable:$true] %s16_s13  ;;  %s28_s16 = int_to_ptr.hbm [resolvable:$true] %s27_s16 }
   0x4   :  { %s169_s17 = smov 128   ;;  %s170_s18 = smov 8  }
   0x5   :  { %22 = dma.hbm_to_vmem [thread:$0]  %s15_s11, 256, %s17_s13, [#allocation3], %s169_s17, %s169_s17, %s170_s18  }
   0x6   :  { %s171_s19 = smov [#allocation5]  }
   0x7   :  { %s29_s20 = sshll.u32 %s171_s19, 4  ;;  %s30_s20 = int_to_ptr.vmem [resolvable:$true] %s29_s20 }
   0x8   :  { %35 = dma.hbm_to_vmem [thread:$0]  %s28_s16, 256, %s30_s20, [#allocation6], %s169_s17, %s169_s17, %s170_s18  }
   0x9   :  { %162 = dma.done.wait [#allocation3], 256  }
   0xa   :  { %163 = vsyncadd [#allocation3], 4294967040 }
   0xb   :  { %164 = dma.done.wait [#allocation6], 256  }
   0xc   :  { %165 = vsyncadd [#allocation6], 4294967040  ;;  %v44_v0 = vld [vmem:[#allocation2] sm:$0xff]  ;;  %v45_v1 = vld [vmem:[#allocation2 + $0x8] sm:$0xff]  ;;  %s172_s0 = smov [#allocation7]   ;;  %s72_s23 = sshll.u32 %s199_s2, 4  ;;  %s73_s23 = int_to_ptr.hbm [resolvable:$true] %s72_s23 }
   0xd   :  { %v46_v2 = vld [vmem:[#allocation5] sm:$0xff]  ;;  %v47_v3 = vld [vmem:[#allocation5 + $0x8] sm:$0xff]  ;;  %s70_s1 = sshll.u32 %s172_s0, 4  ;;  %vm63_vm0 = vcmask 0   ;;  %s71_s1 = int_to_ptr.vmem [resolvable:$true] %s70_s1 }
   0xe   :  { %v48_v4 = vsub.f32 %v44_v0, %v46_v2  ;;  %v49_v5 = vsub.f32 %v45_v1, %v47_v3 }
  0x10   :  { %v50_v6 = vmul.f32 %v48_v4, %v48_v4  ;;  %v51_v7 = vmul.f32 %v49_v5, %v49_v5 }
  0x12   :  { %v52_v8 = vadd.f32 %v51_v7, %v50_v6 }
  0x14   :  { %53 = vadd.xlane.f32.xlu0 %v52_v8 }
  0x87   :  { %v54_v9 = vpop.xlane.xlu0 %53 }
  0x88   :  { %v55_v10 = vrot.slane %v54_v9, 4 }
  0x8a   :  { %v56_v11 = vadd.f32 %v55_v10, %v54_v9 }
  0x8c   :  { %v57_v12 = vrot.slane %v56_v11, 2 }
  0x8e   :  { %v58_v13 = vadd.f32 %v57_v12, %v56_v11 }
  0x90   :  { %v59_v14 = vrot.slane %v58_v13, 1 }
  0x92   :  { %v60_v15 = vadd.f32 %v59_v14, %v58_v13 }
  0x94   :  { %83 = vpush %v60_v15 }
  0xc5   :  { %s84_s24 = spop %83 }
  0xc6   :  { %v62_v16 = vstv %s84_s24 }
  0xc7   :  { %64 = vst.msk [vmem:[#allocation7] sm:$0x1] %vm63_vm0, %v62_v16 }
  0xc8   :  { %75 = dma.vmem_to_hbm [thread:$0]  %s71_s1, 16, %s73_s23, [#allocation4]  }
  0xc9   :  { %166 = dma.done.wait [#allocation4], 16  }
  0xca   :  { %167 = vsyncadd [#allocation4], 4294967280 }
  0xcb   :  { %80 = vsyncpa [#allocation3], 1 }
  0xcc   :  { %81 = vsyncpa [#allocation6], 1 }
  0xcd   :  { %82 = vsyncpa [#allocation4], 1 }

</bundles_post_ra>
